<compile_context>
chip_gen: v7x
topology: tpu7x:2x2x1
jax: 0.10.0
libtpu: 0.0.40
codegen_flags: <defaults>
</compile_context>

<pallas_src>
import functools

import jax
import jax.numpy as jnp
from jax import lax
from jax.experimental import pallas as pl
from jax.experimental.pallas import tpu as pltpu

NEAR_0 = 1e-10
_LANES = 128


def _lse_kernel(logits_ref, out_ref, m_ref, l_ref, *, t0, tt, row_lo, row_hi):
    """Online logsumexp over vocab, summed over valid rows of one sample.

    logits_ref : VMEM (1, tt, tv)    raw logits tile (f32 or bf16)
    out_ref    : VMEM (1, 1, 128) f32 per-sample sum of lse over valid rows
                                      (accumulator: block index constant across t, v)
    m_ref/l_ref: VMEM (tt, 1) f32    running row max / running exp-sum
    """
    t = pl.program_id(1)
    v = pl.program_id(2)
    nt = pl.num_programs(1)
    nv = pl.num_programs(2)

    # NOTE: correctness relies on the vocab axis being the innermost grid axis
    # (and the T axis next): scratches reset at v==0, output resets at t==v==0.
    @pl.when(jnp.logical_and(t == 0, v == 0))
    def _():
        out_ref[...] = jnp.zeros_like(out_ref)

    @pl.when(v == 0)
    def _():
        m_ref[...] = jnp.full_like(m_ref, -jnp.inf)
        l_ref[...] = jnp.zeros_like(l_ref)

    # Hot loop: upcast per tile (input may be bf16), accumulate in f32.
    tile = logits_ref[0].astype(jnp.float32)                      # (tt, tv)
    tile_max = jnp.max(tile, axis=-1, keepdims=True)              # (tt, 1)
    m_prev = m_ref[...]
    m_new = jnp.maximum(m_prev, tile_max)
    # TODO(synk): on v7x the lane-sum below could be offloaded to the idle MXU
    # (dot with a ones (tv,128) matrix) if the VPU ever becomes the binding slot.
    l_ref[...] = (jnp.exp(m_prev - m_new) * l_ref[...]
                  + jnp.sum(jnp.exp(tile - m_new), axis=-1, keepdims=True))
    m_ref[...] = m_new

    @pl.when(v == nv - 1)
    def _():
        lse = m_ref[...] + jnp.log(l_ref[...])                    # (tt, 1)
        # Mask rows outside the shifted window [row_lo, row_hi); only boundary
        # T-tiles contain such rows (interior dead rows are never streamed).
        row = (t0 + t) * tt + lax.broadcasted_iota(jnp.int32, (tt, 1), 0)
        valid = jnp.logical_and(row >= row_lo, row < row_hi)
        out_ref[...] = out_ref[...] + jnp.sum(jnp.where(valid, lse, 0.0))


def _pick_tiles(T, V, max_elems=2 * 1024 * 1024):
    """Pick (tt, tv): largest vocab tile first (DMA chunk size), then largest
    T tile, keeping tt*tv <= max_elems (~8 MiB f32 incl. f32 upcast temps)."""
    tv_cands = sorted({c for c in (8192, 4096, 2048, 1024, 512, 256, 128)
                       if V % c == 0} | {V}, reverse=True)
    tt_cands = sorted({c for c in (1024, 512, 256, 128, 64, 32, 16, 8)
                       if T % c == 0} | {T}, reverse=True)
    for tv in tv_cands:
        fits = [tt for tt in tt_cands if tt * tv <= max_elems]
        if fits:
            return max(fits), tv
    return min(tt_cands), min(tv_cands)   # still correct, just small tiles


def my_loss(outputs, targets, ratings, stage, max_topic_len,
            tile_t=None, tile_v=None):
    """Pallas implementation of MyLoss.forward.

    outputs: (B, max_topic_len + S + 1, V)  float32 or bfloat16 (bf16 preferred)
    targets: (B, S + 1) int
    ratings: (B,) float
    """
    B, T, V = outputs.shape
    S = T - max_topic_len - 1
    assert S >= 1 and targets.shape == (B, S + 1)
    row_lo, row_hi = max_topic_len, T - 1          # valid (shifted) logit rows

    itemsize = jnp.dtype(outputs.dtype).itemsize
    tt_auto, tv_auto = _pick_tiles(T, V)
    tt = tt_auto if tile_t is None else tile_t
    tv = tv_auto if tile_v is None else tile_v
    assert V % tv == 0 and (tv % 128 == 0 or tv == V), (tv, V)
    assert tt == T or (T % tt == 0 and tt % 8 == 0), (tt, T)
    nv = V // tv
    t0 = row_lo // tt                               # first T-tile with a valid row
    t_last = (row_hi - 1) // tt                     # last T-tile with a valid row
    nt = t_last - t0 + 1                            # dead prefix/suffix never streamed

    kernel = functools.partial(_lse_kernel, t0=t0, tt=tt,
                               row_lo=row_lo, row_hi=row_hi)

    # Double-buffered input tile + ~3 f32 temporaries of tile size + slack.
    tile_bytes = tt * tv * itemsize
    vmem_limit = int(max(32 << 20, 2 * tile_bytes + 3 * tt * tv * 4 + (4 << 20)))

    streamed = B * nt * tt * V                      # elements actually read from HBM
    cost = pl.CostEstimate(flops=4 * streamed, transcendentals=streamed,
                           bytes_accessed=streamed * itemsize + B * _LANES * 4)

    grid_spec = pltpu.PrefetchScalarGridSpec(
        num_scalar_prefetch=0,
        grid=(B, nt, nv),                           # vocab axis must stay innermost
        in_specs=[pl.BlockSpec((1, tt, tv), lambda b, t, v: (b, t0 + t, v))],
        out_specs=pl.BlockSpec((1, 1, _LANES), lambda b, t, v: (b, 0, 0)),
        scratch_shapes=[pltpu.VMEM((tt, 1), jnp.float32),    # running max
                        pltpu.VMEM((tt, 1), jnp.float32)],   # running exp-sum
    )

    lse_sum = pl.pallas_call(
        kernel,
        out_shape=jax.ShapeDtypeStruct((B, 1, _LANES), jnp.float32),
        grid_spec=grid_spec,
        compiler_params=pltpu.CompilerParams(
            # B "parallel" feeds both v7x TensorCores when B >= 2.
            # TODO(synk): for B == 1 on v7x, split the vocab axis across cores.
            dimension_semantics=("parallel", "arbitrary", "arbitrary"),
            vmem_limit_bytes=vmem_limit),
        cost_estimate=cost,
    )(outputs)[:, 0, 0]                             # (B,)

    # --- tiny per-sample epilogue in plain JAX (negligible HBM traffic) ---
    thresh = 4.0 if stage == 1 else 3.0
    y = (ratings > thresh).astype(jnp.float32)                          # (B,)

    # Label logits via a B*S-element gather on the raw outputs (no slice copy,
    # and no per-tile select-reduce inside the kernel's hot loop).
    rows = max_topic_len + jnp.arange(S)                                 # (S,)
    label_logits = outputs[jnp.arange(B)[:, None], rows[None, :],
                           targets[:, 1:].astype(jnp.int32)]             # (B, S)
    label_sum = jnp.sum(label_logits.astype(jnp.float32), axis=-1)       # (B,)

    mean_ce = (lse_sum - label_sum) / jnp.float32(S)   # CrossEntropyLoss(mean)
    p = jnp.exp(-mean_ce)
    loss = -y * jnp.log(p + NEAR_0) - (1.0 - y) * jnp.log(1.0 - p + NEAR_0)
    return jnp.mean(loss)


def ref_loss(outputs, targets, ratings, stage, max_topic_len):
    """Pure-JAX reference mirroring the PyTorch forward."""
    thresh = 4.0 if stage == 1 else 3.0
    y = jnp.where(ratings > thresh, 1.0, 0.0)
    shift_logits = outputs[:, max_topic_len:-1, :].astype(jnp.float32)
    shift_labels = targets[:, 1:]
    logp = jax.nn.log_softmax(shift_logits, axis=-1)
    ce = -jnp.take_along_axis(logp, shift_labels[..., None], axis=-1)[..., 0]
    ce_mean = jnp.mean(ce, axis=-1)
    p = jnp.exp(-ce_mean)
    li = -y * jnp.log(p + NEAR_0) - (1.0 - y) * jnp.log(1.0 - p + NEAR_0)
    return jnp.mean(li)


if __name__ == "__main__":
    key = jax.random.PRNGKey(0)
    k1, k2, k3, k4, k5 = jax.random.split(key, 5)

    # --- Config A: tiny shapes, single T tile, multiple vocab tiles ---
    B, max_topic_len, S, V = 2, 4, 8, 512
    T = max_topic_len + S + 1
    outputs = jax.random.normal(k1, (B, T, V), dtype=jnp.float32)
    targets = jax.random.randint(k2, (B, S + 1), 0, V, dtype=jnp.int32)
    ratings = jax.random.randint(k3, (B,), 0, 6).astype(jnp.float32)
    stage = 1

    expected = ref_loss(outputs, targets, ratings, stage, max_topic_len)

    # Multi-vocab-tile path (exercises the online logsumexp across 4 V-tiles).
    got = my_loss(outputs, targets, ratings, stage, max_topic_len, tile_v=128)
    got = jax.block_until_ready(got)
    assert jnp.allclose(got, expected, rtol=1e-5, atol=1e-5), (got, expected)

    # Auto tile selection (single full-vocab / full-T tile at these shapes).
    got_auto = jax.block_until_ready(
        my_loss(outputs, targets, ratings, stage, max_topic_len))
    assert jnp.allclose(got_auto, expected, rtol=1e-5, atol=1e-5), (got_auto, expected)

    # bf16 logits path (recommended production input; halves HBM traffic).
    outputs_bf16 = outputs.astype(jnp.bfloat16)
    expected_bf16 = ref_loss(outputs_bf16, targets, ratings, stage, max_topic_len)
    got_bf16 = jax.block_until_ready(
        my_loss(outputs_bf16, targets, ratings, stage, max_topic_len, tile_v=128))
    assert jnp.allclose(got_bf16, expected_bf16, rtol=1e-4, atol=1e-4), (
        got_bf16, expected_bf16)

    # --- Config B: T-tiled grid with dead-row skipping (t0 > 0), stage 2 ---
    B2, topic2, S2, V2 = 2, 16, 31, 256
    T2 = topic2 + S2 + 1
    outputs2 = jax.random.normal(k4, (B2, T2, V2), dtype=jnp.float32)
    targets2 = jax.random.randint(k5, (B2, S2 + 1), 0, V2, dtype=jnp.int32)
    ratings2 = jnp.array([2.0, 5.0], dtype=jnp.float32)
    expected2 = ref_loss(outputs2, targets2, ratings2, 2, topic2)
    got2 = jax.block_until_ready(
        my_loss(outputs2, targets2, ratings2, 2, topic2, tile_t=16, tile_v=128))
    assert jnp.allclose(got2, expected2, rtol=1e-5, atol=1e-5), (got2, expected2)

    print("KERNEL_OK")
</pallas_src>

<mosaic_0001>
module attributes {stable_mosaic.version = 11 : i64} {
  func.func @_lse_kernel(%arg0: i32, %arg1: i32, %arg2: i32, %arg3: memref<1x13x128xf32, #tpu.memory_space<vmem>>, %arg4: memref<1x1x128xf32, #tpu.memory_space<vmem>>, %arg5: memref<13x1xf32, #tpu.memory_space<vmem>>, %arg6: memref<13x1xf32, #tpu.memory_space<vmem>>) attributes {dimension_semantics = [#tpu.dimension_semantics<parallel>, #tpu.dimension_semantics<arbitrary>, #tpu.dimension_semantics<arbitrary>], iteration_bounds = array<i64: 2, 1, 4>, scalar_prefetch = 0 : i64, scratch_operands = 2 : i64, tpu.core_type = #tpu.core_type<tc>, window_params = [{transform_indices = @transform_0, window_bounds = array<i64: 1, 13, 128>}, {transform_indices = @transform_1, window_bounds = array<i64: 1, 1, 128>}]} {
    %c0_i32 = arith.constant 0 : i32
    %0 = arith.cmpi eq, %arg1, %c0_i32 : i32
    %c0_i32_0 = arith.constant 0 : i32
    %1 = arith.cmpi eq, %arg2, %c0_i32_0 : i32
    %2 = arith.andi %0, %1 : i1
    %3 = arith.extui %2 : i1 to i32
    %c0_i32_1 = arith.constant 0 : i32
    %4 = arith.cmpi ne, %3, %c0_i32_1 : i32
    scf.if %4 {
      %cst_16 = arith.constant 0.000000e+00 : f32
      %29 = vector.broadcast %cst_16 : f32 to vector<1x1x128xf32>
      %c0_17 = arith.constant 0 : index
      %c0_18 = arith.constant 0 : index
      %c0_19 = arith.constant 0 : index
      %30 = vector.load %arg4[%c0_17, %c0_18, %c0_19] : memref<1x1x128xf32, #tpu.memory_space<vmem>>, vector<1x1x128xf32>
      tpu.vector_store %arg4[%c0_17, %c0_18, %c0_19], %29 {strides = array<i32>} : memref<1x1x128xf32, #tpu.memory_space<vmem>>, vector<1x1x128xf32>,
    } else {
    }
    %c0_i32_2 = arith.constant 0 : i32
    %5 = arith.cmpi eq, %arg2, %c0_i32_2 : i32
    %6 = arith.extui %5 : i1 to i32
    %c0_i32_3 = arith.constant 0 : i32
    %7 = arith.cmpi ne, %6, %c0_i32_3 : i32
    scf.if %7 {
      %cst_16 = arith.constant 0xFF800000 : f32
      %29 = vector.broadcast %cst_16 : f32 to vector<13x1xf32>
      %c0_17 = arith.constant 0 : index
      %c0_18 = arith.constant 0 : index
      %30 = vector.load %arg5[%c0_17, %c0_18] : memref<13x1xf32, #tpu.memory_space<vmem>>, vector<13x1xf32>
      tpu.vector_store %arg5[%c0_17, %c0_18], %29 {strides = array<i32>} : memref<13x1xf32, #tpu.memory_space<vmem>>, vector<13x1xf32>,
      %cst_19 = arith.constant 0.000000e+00 : f32
      %31 = vector.broadcast %cst_19 : f32 to vector<13x1xf32>
      %c0_20 = arith.constant 0 : index
      %c0_21 = arith.constant 0 : index
      %32 = vector.load %arg6[%c0_20, %c0_21] : memref<13x1xf32, #tpu.memory_space<vmem>>, vector<13x1xf32>
      tpu.vector_store %arg6[%c0_20, %c0_21], %31 {strides = array<i32>} : memref<13x1xf32, #tpu.memory_space<vmem>>, vector<13x1xf32>,
    } else {
    }
    %c0 = arith.constant 0 : index
    %c0_4 = arith.constant 0 : index
    %c0_5 = arith.constant 0 : index
    %8 = vector.load %arg3[%c0, %c0_4, %c0_5] : memref<1x13x128xf32, #tpu.memory_space<vmem>>, vector<1x13x128xf32>
    %9 = vector.shape_cast %8 : vector<1x13x128xf32> to vector<13x128xf32>
    %cst = arith.constant dense<0xFF800000> : vector<13xf32>
    %10 = vector.multi_reduction <maximumf>, %9, %cst [1] : vector<13x128xf32> to vector<13xf32>
    %11 = vector.shape_cast %10 : vector<13xf32> to vector<13x1xf32>
    %c0_6 = arith.constant 0 : index
    %c0_7 = arith.constant 0 : index
    %12 = vector.load %arg5[%c0_6, %c0_7] : memref<13x1xf32, #tpu.memory_space<vmem>>, vector<13x1xf32>
    %13 = arith.maximumf %12, %11 : vector<13x1xf32>
    %14 = arith.subf %12, %13 : vector<13x1xf32>
    %15 = math.exp %14 : vector<13x1xf32>
    %c0_8 = arith.constant 0 : index
    %c0_9 = arith.constant 0 : index
    %16 = vector.load %arg6[%c0_8, %c0_9] : memref<13x1xf32, #tpu.memory_space<vmem>>, vector<13x1xf32>
    %17 = arith.mulf %15, %16 : vector<13x1xf32>
    %18 = vector.broadcast %13 : vector<13x1xf32> to vector<13x128xf32>
    %19 = arith.subf %9, %18 : vector<13x128xf32>
    %20 = math.exp %19 : vector<13x128xf32>
    %cst_10 = arith.constant dense<0.000000e+00> : vector<13xf32>
    %21 = vector.multi_reduction <add>, %20, %cst_10 [1] : vector<13x128xf32> to vector<13xf32>
    %22 = vector.shape_cast %21 : vector<13xf32> to vector<13x1xf32>
    %23 = arith.addf %17, %22 : vector<13x1xf32>
    %c0_11 = arith.constant 0 : index
    %c0_12 = arith.constant 0 : index
    %24 = vector.load %arg6[%c0_11, %c0_12] : memref<13x1xf32, #tpu.memory_space<vmem>>, vector<13x1xf32>
    tpu.vector_store %arg6[%c0_11, %c0_12], %23 {strides = array<i32>} : memref<13x1xf32, #tpu.memory_space<vmem>>, vector<13x1xf32>,
    %c0_13 = arith.constant 0 : index
    %c0_14 = arith.constant 0 : index
    %25 = vector.load %arg5[%c0_13, %c0_14] : memref<13x1xf32, #tpu.memory_space<vmem>>, vector<13x1xf32>
    tpu.vector_store %arg5[%c0_13, %c0_14], %13 {strides = array<i32>} : memref<13x1xf32, #tpu.memory_space<vmem>>, vector<13x1xf32>,
    %c3_i32 = arith.constant 3 : i32
    %26 = arith.cmpi eq, %arg2, %c3_i32 : i32
    %27 = arith.extui %26 : i1 to i32
    %c0_i32_15 = arith.constant 0 : i32
    %28 = arith.cmpi ne, %27, %c0_i32_15 : i32
    scf.if %28 {
      %c0_16 = arith.constant 0 : index
      %c0_17 = arith.constant 0 : index
      %29 = vector.load %arg5[%c0_16, %c0_17] : memref<13x1xf32, #tpu.memory_space<vmem>>, vector<13x1xf32>
      %c0_18 = arith.constant 0 : index
      %c0_19 = arith.constant 0 : index
      %30 = vector.load %arg6[%c0_18, %c0_19] : memref<13x1xf32, #tpu.memory_space<vmem>>, vector<13x1xf32>
      %31 = math.log %30 : vector<13x1xf32>
      %32 = arith.addf %29, %31 : vector<13x1xf32>
      %c0_i32_20 = arith.constant 0 : i32
      %33 = arith.addi %c0_i32_20, %arg1 : i32
      %c13_i32 = arith.constant 13 : i32
      %34 = arith.muli %33, %c13_i32 : i32
      %35 = tpu.iota {dimensions = array<i32: 0>} : vector<13x1xi32>
      %36 = vector.broadcast %34 : i32 to vector<13x1xi32>
      %37 = arith.addi %36, %35 : vector<13x1xi32>
      %c4_i32 = arith.constant 4 : i32
      %38 = vector.broadcast %c4_i32 : i32 to vector<13x1xi32>
      %39 = arith.cmpi sge, %37, %38 : vector<13x1xi32>
      %c12_i32 = arith.constant 12 : i32
      %40 = vector.broadcast %c12_i32 : i32 to vector<13x1xi32>
      %41 = arith.cmpi slt, %37, %40 : vector<13x1xi32>
      %42 = arith.andi %39, %41 : vector<13x1xi1>
      %c0_21 = arith.constant 0 : index
      %c0_22 = arith.constant 0 : index
      %c0_23 = arith.constant 0 : index
      %43 = vector.load %arg4[%c0_21, %c0_22, %c0_23] : memref<1x1x128xf32, #tpu.memory_space<vmem>>, vector<1x1x128xf32>
      %cst_24 = arith.constant 0.000000e+00 : f32
      %44 = vector.broadcast %cst_24 : f32 to vector<13x1xf32>
      %45 = arith.select %42, %32, %44 : vector<13x1xi1>, vector<13x1xf32>
      %46 = vector.shape_cast %45 : vector<13x1xf32> to vector<1x13x1xf32>
      %cst_25 = arith.constant dense<0.000000e+00> : vector<1xf32>
      %47 = vector.multi_reduction <add>, %46, %cst_25 [1, 2] : vector<1x13x1xf32> to vector<1xf32>
      %48 = vector.shape_cast %47 : vector<1xf32> to vector<1x1x1xf32>
      %49 = vector.extract %48[0, 0, 0] : f32 from vector<1x1x1xf32>
      %50 = vector.broadcast %49 : f32 to vector<1x1x128xf32>
      %51 = arith.addf %43, %50 : vector<1x1x128xf32>
      %c0_26 = arith.constant 0 : index
      %c0_27 = arith.constant 0 : index
      %c0_28 = arith.constant 0 : index
      %52 = vector.load %arg4[%c0_26, %c0_27, %c0_28] : memref<1x1x128xf32, #tpu.memory_space<vmem>>, vector<1x1x128xf32>
      tpu.vector_store %arg4[%c0_26, %c0_27, %c0_28], %51 {strides = array<i32>} : memref<1x1x128xf32, #tpu.memory_space<vmem>>, vector<1x1x128xf32>,
    } else {
    }
    return
  }
  func.func @transform_0(%arg0: i32, %arg1: i32, %arg2: i32) -> (i32, i32, i32) {
    %c0_i32 = arith.constant 0 : i32
    %0 = arith.addi %c0_i32, %arg1 : i32
    %c0_i32_0 = arith.constant 0 : i32
    return %arg0, %0, %arg2 : i32, i32, i32
  }
  func.func @transform_1(%arg0: i32, %arg1: i32, %arg2: i32) -> (i32, i32, i32) {
    %c0_i32 = arith.constant 0 : i32
    %c0_i32_0 = arith.constant 0 : i32
    %c0_i32_1 = arith.constant 0 : i32
    return %arg0, %c0_i32, %c0_i32_0 : i32, i32, i32
  }
}

</mosaic_0001>

<bundles_post_ra>
// kernel: tpu_custom_call.1
= control target key start
LH: loop header
LB: loop body
LE: loop exit
PB: predicated region body
PF: predicated region fallthrough
CT: control target
= control target key end

     0   :  { %6 = vsyncpa [#allocation6], 0  ;;  %s816_s0 = inlined_call_operand.vmem [shape: f32[2,13,512], index: 0, kind: input, shape index: {}]   ;;  %s817_s1 = inlined_call_operand.hbm [shape: f32[2,1,128], index: 1, kind: output, shape index: {}]  }
   0x1   :  { %8 = vsyncpa [#allocation6 + $0x1], 0  ;;  %s635_s6 = smov 0   ;;  %s637_s7 = smov 0  }
   0x2   :  { %s639_s8 = smov 0   ;;  %s641_s9 = smov 0  }
   0x3   :  { %s643_s10 = smov 0   ;;  %s645_s11 = smov 0  }
   0x4   :  { %s647_s12 = smov 0   ;;  %s649_s13 = smov 0  }
   0x5   :  { %s651_s14 = smov 0   ;;  %s653_s15 = smov 0  }
   0x6 LB: > { %s385_s16 = sadd.s32 4294967295, %s618_s15   ;;  %s386_s17 = sadd.s32 4294967294, %s618_s15   ;;  %s618_s15 = sphi %s653_s15, %s14_s15   ;;  %s614_s14 = sphi %s651_s14, %s829_s14   ;;  %s610_s13 = sphi %s649_s13, %s828_s13   ;;  %s606_s12 = sphi %s647_s12, %s827_s12   ;;  %s602_s11 = sphi %s645_s11, %s826_s11   ;;  %s598_s10 = sphi %s643_s10, %s825_s10   ;;  %s594_s9 = sphi %s641_s9, %s824_s9   ;;  %s590_s8 = sphi %s639_s8, %s823_s8   ;;  %s586_s7 = sphi %s637_s7, %s822_s7   ;;  %s582_s6 = sphi %s635_s6, %s821_s6  }
   0x7   : > { %s26_s18 = sadd.s32 1, %s610_s13  ;;  %s33_s19 = sadd.s32 1, %s614_s14 }
   0x8   : > { %p27_p0 = scmp.ge.s32.totalorder %s26_s18, 4  ;;  %s44_s20 = sadd.s32 1, %s598_s10 }
   0x9   : > { %p51_p1 = scmp.ne.s32.totalorder %s598_s10, %s594_s9  ;;  %p52_p2 = scmp.eq.s32.totalorder %s618_s15, 0 }
   0xa   : > { %s831_s18 = smov (%p27_p0, %s26_s18), 0  ;;  %s833_s19 = smov (!%p27_p0, %s33_s19), %s614_s14 }
   0xb   : > { %s40_s21 = ssub.s32 %s610_s13, %s831_s18  ;;  %p698_p3 = por %p52_p2, %p51_p1 }
   0xc   : > { %p35_p4 = scmp.ge.s32.totalorder %s833_s19, 2  ;;  %s70_s23 = sadd.s32 1, %s590_s8 }
   0xd   : > { %p80_p5 = scmp.ne.s32.totalorder %s590_s8, %s586_s7  ;;  %p81_p6 = scmp.eq.s32.totalorder %s385_s16, 7 }
   0xe   : > { %s835_s19 = smov (%p35_p4, %s833_s19), 0  ;;  %p86_p8 = scmp.ne.s32.totalorder %s586_s7, %s582_s6 }
   0xf   : > { %p707_p7 = por %p81_p6, %p80_p5  ;;  %s37_s25 = ssub.s32 %s614_s14, %s835_s19 }
  0x10   : > { %p87_p9 = scmp.eq.s32.totalorder %s386_s17, 7  ;;  %s41_s26 = sor.u32 %s40_s21, %s37_s25 }
  0x11   : > { %p68_p10 = scmp.eq.s32.totalorder %s37_s25, 0  ;;  %p42_p11 = scmp.eq.s32.totalorder %s41_s26, 0 }
  0x12   : > { %p715_p12 = por %p87_p9, %p86_p8  ;;  %p388_p13 = scmp.ge.s32.totalorder %s618_s15, 8 }
  0x13   : > { %s720_s28 = scalar_select %p68_p10, %s590_s8, %s70_s23  }
  0x14   : > { %s723_s29 = scalar_select %p42_p11, %s598_s10, %s44_s20  }
  0x15   : > { %103 = sbr.rel (%p388_p13) target bundleno = 36 (0x24), region = 16 }
  0x1c   : > { %106 = sbr.rel (!%p698_p3) target bundleno = 36 (0x24), region = 20  ;;  %s108_s30 = sand.u32 (%p698_p3), 1, %s598_s10  }
  0x1d   : > { %s390_s2 = sshll.u32 (%p698_p3), %s614_s14, 3  ;;  %s389_s3 = sshll.u32 (%p698_p3), %s108_s30, 4 }
  0x1e   : > { %s115_s4 = sadd.s32 (%p698_p3), %s610_s13, %s390_s2  ;;  %s110_s20 = scalar_lea.vmem (%p698_p3), [#allocation4], %s389_s3 }
  0x1f   : > { %s391_s5 = sshll.u32 (%p698_p3), %s115_s4, 3 }
  0x20   : > { %s117_s21 = scalar_lea.vmem (%p698_p3), %s816_s0, %s391_s5 }
  0x21   : > { %v147_v0 = vld [vmem:[%s117_s21] sm:$0xff] (%p698_p3) }
  0x22   : > { %v149_v1 = vld [vmem:[%s117_s21 + $0x20] sm:$0xff] (%p698_p3)  ;;  %148 = vst [vmem:[%s110_s20] sm:$0xff] (%p698_p3), %v147_v0 }
  0x23   : > { %150 = vst [vmem:[%s110_s20 + $0x8] sm:$0xff] %v149_v1 }
  0x24 PF: > { %p392_p0 = scmp.ge.s32.totalorder %s618_s15, 1  ;;  %p155_p1 = scmp.lt.s32.totalorder %s618_s15, 9 }
  0x26   : > { %p156_p2 = pnand %p392_p0, %p155_p1 }
  0x27   : > { %s162_s22 = sand.u32 (!%p156_p2), 1, %s594_s9   ;;  %s178_s23 = sand.u32 (!%p156_p2), 1, %s586_s7  }
  0x28   : > { %159 = sbr.rel (%p156_p2) target bundleno = 760 (0x2f8), region = 58  ;;  %s393_s25 = sshll.u32 (!%p156_p2), %s162_s22, 4 }
  0x29   : > { %p182_p3 = scmp.eq.s32.totalorder (!%p156_p2), %s602_s11, 0  ;;  %s164_s26 = scalar_lea.vmem (!%p156_p2), [#allocation4], %s393_s25 }
  0x2a   : > { %s741_s30 = scalar_lea.vmem (!%p156_p2), [#allocation5], %s178_s23 }
  0x2f   : > { %186 = sbr.rel (!%p182_p3) target bundleno = 54 (0x36), region = 66  ;;  %v620_v2 = vmov (%p182_p3), 0.0  }
  0x30   : > { %187 = vst [vmem:[%s741_s30] sm:$0x1] (%p182_p3), %v620_v2 }
  0x36 PF: > { %p395_p4 = scmp.ne.s32.totalorder %s602_s11, 0 }
  0x37   : > { %vm191_vm0 = vcmask (!%p395_p4), 7168   ;;  %vm193_vm1 = vcmask (!%p395_p4), 4096   ;;  %v621_v3 = vmov (!%p395_p4), -inf   ;;  %v622_v4 = vmov (!%p395_p4), 0.0  }
  0x38   : > { %190 = sbr.rel (%p395_p4) target bundleno = 63 (0x3f), region = 70  ;;  %192 = vst.msk [vmem:[#allocation2] sm:$0xff] (!%p395_p4), %vm191_vm0, %v621_v3  ;;  %195 = vst.msk [vmem:[#allocation3] sm:$0xff] (!%p395_p4), %vm191_vm0, %v622_v4 }
  0x39   : > { %194 = vst.msk [vmem:[#allocation2 + $0x8] sm:$0x1f] (!%p395_p4), %vm193_vm1, %v621_v3  ;;  %196 = vst.msk [vmem:[#allocation3 + $0x8] sm:$0x1f] (!%p395_p4), %vm193_vm1, %v622_v4 }
  0x3f PF: > { %v198_v5 = vld [vmem:[%s164_s26 + $0x8] sm:$0x1f]  ;;  %vm201_vm2 = vcmask 1044480   ;;  %v197_v7 = vld [vmem:[%s164_s26] sm:$0xff]  ;;  %v623_v8 = vmov 0   ;;  %vm244_vm3 = vcmask 4096  }
  0x40   : > { %v202_v6 = vsel %vm201_vm2, %v198_v5, -inf  ;;  %494 = vset.pattern.permute.xlu1 %v623_v8  ;;  %495 = vset.pattern.permute.xlu0 %v623_v8  ;;  %v206_v9 = vld [vmem:[#allocation2 + $0x8] sm:$0x1f]  ;;  %v205_v12 = vld [vmem:[#allocation2] sm:$0xff]  ;;  %vm242_vm4 = vcmask 7168   ;;  %v215_v32 = vld [vmem:[#allocation3] sm:$0xff] }
  0x41   : > { %203 = vmax.xlane.f32.xlu0 %v202_v6  ;;  %v216_v29 = vld [vmem:[#allocation3 + $0x8] sm:$0x1f]  ;;  %p396_p5 = scmp.ne.s32.totalorder %s602_s11, 3 }
  0x42   : > { %v263_v40 = vlaneseq (!%p396_p5)  ;;  %v275_v63 = vld [vmem:[%s741_s30] sm:$0x1] (!%p396_p5) }
  0x44   : > { %v264_v41 = vshrl.u32 (!%p396_p5), %v263_v40, 7 }
  0x45   : > { %199 = vmax.xlane.f32.xlu0 %v197_v7 }
  0x46   : > { %v265_v42 = vadd.s32 (!%p396_p5), 8, %v264_v41  ;;  %vm269_vm5 = vcmp.ge.s32.totalorder (!%p396_p5), %v264_v41, 4 }
  0x48   : > { %vm272_vm6 = vcmp.lt.s32.totalorder (!%p396_p5), %v265_v42, 12 }
  0xce   : > { %v204_v10 = vpop.xlane.xlu0 %203 }
  0xcf   : > { %v208_v11 = vmax.f32 %v206_v9, %v204_v10 }
  0xd1   : > { %v210_v13 = vsub.f32 %v206_v9, %v208_v11  ;;  %247 = vst.msk [vmem:[#allocation2 + $0x8] sm:$0x1f] %vm244_vm3, %v208_v11  ;;  %226 = vperm.xlu1 %494, %v208_v11  }
  0xd2   : > { %v200_v14 = vpop.xlane.xlu0 %199 }
  0xd3   : > { %v207_v15 = vmax.f32 %v205_v12, %v200_v14  ;;  %v213_v26 = vmul.f32 1.442695, %v210_v13 }
  0xd5   : > { %v209_v16 = vsub.f32 %v205_v12, %v207_v15  ;;  %246 = vst.msk [vmem:[#allocation2] sm:$0xff] %vm242_vm4, %v207_v15  ;;  %221 = vperm.xlu1 %494, %v207_v15  }
  0xd7   : > { %v211_v27 = vmul.f32 1.442695, %v209_v16 }
  0xd8   : > { %v253_v46 = vld [vmem:[#allocation2 + $0x8] sm:$0x1f] (!%p396_p5) }
  0xdc   : > { %v252_v44 = vld [vmem:[#allocation2] sm:$0xff] (!%p396_p5) }
 0x150   : > { %v227_v17 = vpop.permute.xlu1 %226 }
 0x151   : > { %v230_v18 = vsub.f32 %v198_v5, %v227_v17 }
 0x153   : > { %v233_v19 = vmul.f32 1.442695, %v230_v18 }
 0x154   : > { %v222_v20 = vpop.permute.xlu1 %221 }
 0x155   : > { %496 = vpow2.f32 %v233_v19  ;;  %v229_v21 = vsub.f32 %v197_v7, %v222_v20 }
 0x157   : > { %v231_v22 = vmul.f32 1.442695, %v229_v21 }
 0x159   : > { %498 = vpow2.f32 %v231_v22 }
 0x15a   : > { %500 = vpow2.f32 %v213_v26 }
 0x15b   : > { %502 = vpow2.f32 %v211_v27 }
 0x15f   : > { %v497_v23 = vpop.eup %496 }
 0x160   : > { %v237_v24 = vsel %vm201_vm2, %v497_v23, 0.0 }
 0x161   : > { %238 = vadd.xlane.f32.xlu1 %v237_v24 }
 0x163   : > { %v499_v25 = vpop.eup %498 }
 0x164   : > { %235 = vadd.xlane.f32.xlu0 %v499_v25  ;;  %v501_v28 = vpop.eup %500 }
 0x165   : > { %v503_v30 = vpop.eup %502  ;;  %v218_v31 = vmul.f32 %v501_v28, %v216_v29 }
 0x166   : > { %v217_v35 = vmul.f32 %v503_v30, %v215_v32 }
 0x1ee   : > { %v239_v33 = vpop.xlane.xlu1 %238  ;;  %251 = sbr.rel (%p396_p5) target bundleno = 736 (0x2e0), region = 74 }
 0x1ef   : > { %v241_v34 = vadd.f32 %v239_v33, %v218_v31 }
 0x1f1   : > { %245 = vst.msk [vmem:[#allocation3 + $0x8] sm:$0x1f] %vm244_vm3, %v241_v34  ;;  %v236_v36 = vpop.xlane.xlu0 %235 }
 0x1f2   : > { %v240_v37 = vadd.f32 %v236_v36, %v217_v35 }
 0x1f4   : > { %243 = vst.msk [vmem:[#allocation3] sm:$0xff] %vm242_vm4, %v240_v37 }
 0x1f8   : > { %v255_v39 = vld [vmem:[#allocation3 + $0x8] sm:$0x1f] }
 0x1fb   : > { %v254_v38 = vld [vmem:[#allocation3] sm:$0xff] }
 0x1fc   : > { %504 = vlog2.f32 %v254_v38 }
 0x1fd   : > { %506 = vlog2.f32 %v255_v39 }
 0x206   : > { %v505_v43 = vpop.eup %504 }
 0x207   : > { %v507_v45 = vpop.eup %506  ;;  %v257_v47 = vmul.f32 0.6931472, %v505_v43 }
 0x208   : > { %v259_v48 = vmul.f32 0.6931472, %v507_v45 }
 0x209   : > { %v260_v49 = vadd.f32 %v257_v47, %v252_v44 }
 0x20a   : > { %v261_v50 = vadd.f32 %v259_v48, %v253_v46 }
 0x20b   : > { %v276_v51 = vsel %vm269_vm5, %v260_v49, 0.0 }
 0x20c   : > { %v277_v52 = vsel %vm272_vm6, %v261_v50, 0.0  ;;  %v278_v53 = vsel %vm242_vm4, %v276_v51, 0.0 }
 0x20d   : > { %v279_v54 = vsel %vm244_vm3, %v277_v52, 0.0 }
 0x20e   : > { %v280_v55 = vadd.f32 %v279_v54, %v278_v53 }
 0x210   : > { %281 = vadd.xlane.f32.xlu0 %v280_v55 }
 0x29d   : > { %v282_v56 = vpop.xlane.xlu0 %281 }
 0x29e   : > { %v283_v57 = vrot.slane %v282_v56, 4 }
 0x2a0   : > { %v284_v58 = vadd.f32 %v283_v57, %v282_v56 }
 0x2a2   : > { %v285_v59 = vrot.slane %v284_v58, 2 }
 0x2a4   : > { %v286_v60 = vadd.f32 %v285_v59, %v284_v58 }
 0x2a6   : > { %v287_v61 = vrot.slane %v286_v60, 1 }
 0x2a8   : > { %v288_v62 = vadd.f32 %v287_v61, %v286_v60 }
 0x2aa   : > { %401 = vpush %v288_v62 }
 0x2db   : > { %s402_s9 = spop %401 }
 0x2dc   : > { %v290_v0 = vstv %s402_s9 }
 0x2dd   : > { %v291_v1 = vadd.f32 %v290_v0, %v275_v63 }
 0x2df   : > { %292 = vst [vmem:[%s741_s30] sm:$0x1] %v291_v1 }
 0x2e0 PF: > { %s397_s11 = sshll.u32 %s606_s12, 4  ;;  %s306_s5 = sshll.u32 %s741_s30, 4  ;;  %s307_s5 = int_to_ptr.vmem [resolvable:$true] %s306_s5 }
 0x2e1   : > { %s760_s4 = scalar_lea.hbm %s817_s1, %s397_s11  ;;  %s294_s16 = scalar_lea.sflag [#allocation6], %s178_s23 }
 0x2e2   : > { %s508_s17 = scalar_lea.vmem %s307_s5, 16  ;;  %s624_s21 = smov [#allocation5]  }
 0x2e3   : > { %p509_p6 = scmp.ne.s32.totalorder %s307_s5, %s508_s17  ;;  %s512_s20 = sshll.u32 %s624_s21, 4  ;;  %s513_s20 = int_to_ptr.vmem [resolvable:$false] %s512_s20 }
 0x2e4   : > { %s514_s22 = scalar_lea.vmem %s513_s20, 32  ;;  %p515_p10 = scmp.lt.s32.totalorder %s307_s5, %s513_s20 }
 0x2e5   : > { %p510_p8 = pnand %p509_p6, %p707_p7  ;;  %p516_p11 = scmp.lt.s32.totalorder %s514_s22, %s508_s17 }
 0x2e7   : > { %p511_p9 = pneg %p510_p8  ;;  %p517_p13 = por %p516_p11, %p515_p10 }
 0x2e9   : > { %p518_p0 = pnand %p517_p13, %p511_p9 }
 0x2eb   : > { %521 = shalt.err (!%p518_p0)
}
 0x2ec   : > { %s522_s12 = scalar_lea.hbm %s760_s4, 16  ;;  %s526_s26 = scalar_lea.hbm %s817_s1, 32 }
 0x2ed   : > { %p523_p1 = scmp.ne.s32.totalorder %s760_s4, %s522_s12  ;;  %p527_p4 = scmp.lt.u32.totalorder %s760_s4, %s817_s1 }
 0x2ee   : > { %p528_p5 = scmp.lt.u32.totalorder %s526_s26, %s522_s12  ;;  %p530_p8 = scmp.lt.u32.totalorder %s522_s12, %s760_s4 }
 0x2ef   : > { %p524_p2 = pnand %p523_p1, %p707_p7 }
 0x2f0   : > { %p529_p6 = por %p528_p5, %p527_p4 }
 0x2f1   : > { %p525_p3 = pneg %p524_p2 }
 0x2f2   : > { %p531_p9 = por %p530_p8, %p529_p6 }
 0x2f4   : > { %p532_p10 = pnand %p531_p9, %p525_p3 }
 0x2f6   : > { %535 = shalt.err (!%p532_p10)
}
 0x2f7   : > { %403 = dma.vmem_to_hbm [thread:$0]  (%p707_p7), %s307_s5, 16, %s760_s4, %s294_s16  }
 0x2f8 PF: > { %p409_p11 = scmp.ge.s32.totalorder %s618_s15, 2  ;;  %s318_s11 = sand.u32 1, %s582_s6  }
 0x2f9   : > { %s319_s2 = scalar_lea.sflag [#allocation6], %s318_s11 }
 0x2fa   : > { %p406_p13 = pnand %p409_p11, %p715_p12 }
 0x2fc   : > { %577 = dma.done.wait (!%p406_p13), %s319_s2, 16  }
 0x2fd   : > { %579 = vsyncadd (!%p406_p13), %s319_s2, 4294967280  ;;  %s14_s15 = sadd.s32 1, %s618_s15   ;;  %s821_s6 = smov %s586_s7 }
 0x2fe   : > { %p11_p0 = scmp.ge.s32.totalorder %s14_s15, 10   ;;  %s822_s7 = smov %s590_s8 }
 0x2ff   : > { %s823_s8 = smov %s720_s28  ;;  %s824_s9 = smov %s598_s10 }
 0x300   : > { %s825_s10 = smov %s723_s29  ;;  %s826_s11 = smov %s610_s13 }
 0x301   : > { %s827_s12 = smov %s614_s14  ;;  %s828_s13 = smov %s831_s18 }
 0x302   : > { %s829_s14 = smov %s835_s19  ;;  %13 = sbr.rel (!%p11_p0) target bundleno = 6 (0x6), region = 114 }
 0x309   :  { %323 = vsyncpa [#allocation6], 1 }
 0x30a   :  { %325 = vsyncpa [#allocation6 + $0x1], 1 }

</bundles_post_ra>
